<compile_context>
chip_gen: v6e
topology: v6e:2x2x1
jax: 0.10.0
libtpu: 0.0.40
codegen_flags: <defaults>
</compile_context>

<pallas_src>
import jax
import jax.numpy as jnp
from jax.experimental import pallas as pl
from jax.experimental.pallas import tpu as pltpu

_LANE = 128
_MAX_TILE_B = 2048


def _round_up(n, m):
    return ((n + m - 1) // m) * m


def _mlp_kernel(x_ref, w1_ref, w2_ref, w3_ref, b_ref, o_ref):
    # x : (tile_b, D_in)                 activations (feature dim unpadded)
    # w1: (D_in, H_pad)  w2: (H_pad, H_pad)  w3: (H_pad, O)
    # b : (3, W) f32, rows [b1, b2, b3], each zero-padded along lanes
    h_pad = w1_ref.shape[1]
    o = o_ref.shape[1]
    w_dtype = w1_ref.dtype

    x = x_ref[...].astype(w_dtype)
    b = b_ref[...]

    h1 = jnp.dot(x, w1_ref[...], preferred_element_type=jnp.float32)
    h1 = jnp.maximum(h1 + b[0:1, :h_pad], 0.0)          # bias + ReLU (f32 VPU)
    # Dropout(0.3): identity in eval mode.

    h2 = jnp.dot(h1.astype(w_dtype), w2_ref[...],
                 preferred_element_type=jnp.float32)
    h2 = jnp.maximum(h2 + b[1:2, :h_pad], 0.0)          # bias + ReLU
    # Dropout(0.3): identity in eval mode.

    out = jnp.dot(h2.astype(w_dtype), w3_ref[...],
                  preferred_element_type=jnp.float32)
    o_ref[...] = (out + b[2:3, :o]).astype(o_ref.dtype)


def init_params(key, input_dim, hidden_dim=64, output_dim=2):
    """Deterministic init matching nn.Linear shapes (weights stored (in, out))."""
    ks = jax.random.split(key, 6)

    def linear(kw, kb, fan_in, fan_out):
        bound = 1.0 / jnp.sqrt(fan_in)
        w = jax.random.uniform(kw, (fan_in, fan_out), jnp.float32, -bound, bound)
        b = jax.random.uniform(kb, (1, fan_out), jnp.float32, -bound, bound)
        return w, b

    w1, b1 = linear(ks[0], ks[1], input_dim, hidden_dim)
    w2, b2 = linear(ks[2], ks[3], hidden_dim, hidden_dim)
    w3, b3 = linear(ks[4], ks[5], hidden_dim, output_dim)
    return dict(w1=w1, b1=b1, w2=w2, b2=b2, w3=w3, b3=b3)


def pack_params(params, compute_dtype=jnp.float32):
    """One-time (model-load) padding/packing of weights and biases.

    Only the HIDDEN dim is padded to 128 lanes (zero padding is exact); the
    input feature dim of w1 and the output dim of w3 are left at their true
    sizes so x and the output need no padding at all.
    """
    d_in, h = params["w1"].shape
    o = params["w3"].shape[1]
    h_pad = _round_up(h, _LANE)
    w_bias = max(h_pad, o)

    w1 = jnp.pad(params["w1"], ((0, 0), (0, h_pad - h))).astype(compute_dtype)
    w2 = jnp.pad(params["w2"], ((0, h_pad - h), (0, h_pad - h))).astype(compute_dtype)
    w3 = jnp.pad(params["w3"], ((0, h_pad - h), (0, 0))).astype(compute_dtype)

    def _row(b, width):
        b = jnp.asarray(b, jnp.float32).reshape(1, -1)
        return jnp.pad(b, ((0, 0), (0, w_bias - width)))

    b_all = jnp.concatenate(
        [_row(params["b1"], h), _row(params["b2"], h), _row(params["b3"], o)],
        axis=0)                                         # (3, W) f32
    return dict(w1=w1, w2=w2, w3=w3, b=b_all)


def _auto_tile_b(B, d_in, o, h_pad, x_itemsize, packed_bytes):
    """Device-aware batch tile: fill VMEM budget, cap at 2048, >=2 grid steps."""
    granule = 8 if x_itemsize >= 4 else 16              # (bf16 packs 16 sublanes)
    try:
        vmem = pltpu.get_tpu_info().vmem_capacity_bytes
    except Exception:
        vmem = 64 << 20                                  # conservative (v7x-sized)
    budget = vmem // 4                                   # stay well inside scoped VMEM
    # double-buffered x & out tiles + f32 intermediates, per batch row
    per_row = 2 * d_in * x_itemsize + 2 * o * 4 + 2 * h_pad * 4
    cap = max(granule, (budget - packed_bytes) // max(per_row, 1))
    tile = min(_MAX_TILE_B, cap, _round_up(B, granule))
    # >=2 grid steps when the batch allows: lets dimension_semantics=("parallel",)
    # shard the batch axis across v7x's two TensorCores; ~0.35us extra on 1-TC chips.
    if B >= 2 * granule and pl.cdiv(B, tile) < 2:
        tile = _round_up(pl.cdiv(B, 2), granule)
    tile = max(granule, (tile // granule) * granule)
    return int(tile)


def sentence_to_vector_forward(x, packed, *, tile_b=None):
    """Fused MLP forward (eval mode). x: (B, D_in); packed = pack_params(...)."""
    B, d_in = x.shape
    h_pad = packed["w1"].shape[1]
    o = packed["w3"].shape[1]
    w_bias = packed["b"].shape[1]
    assert packed["w1"].shape[0] == d_in

    granule = 8 if x.dtype.itemsize >= 4 else 16
    if tile_b is None:
        packed_bytes = 2 * sum(int(packed[k].size) * packed[k].dtype.itemsize
                               for k in ("w1", "w2", "w3", "b"))
        tile_b = _auto_tile_b(B, d_in, o, h_pad, x.dtype.itemsize, packed_bytes)
    tile_b = _round_up(max(int(tile_b), granule), granule)
    if tile_b >= B:
        tile_b = B            # single block; block dim == full array dim is legal
    grid = (pl.cdiv(B, tile_b),)

    return pl.pallas_call(
        _mlp_kernel,
        out_shape=jax.ShapeDtypeStruct((B, o), jnp.float32),
        grid=grid,
        in_specs=[
            pl.BlockSpec((tile_b, d_in), lambda i: (i, 0)),   # x: streamed, unpadded
            pl.BlockSpec((d_in, h_pad), lambda i: (0, 0)),    # w1 (grid-invariant)
            pl.BlockSpec((h_pad, h_pad), lambda i: (0, 0)),   # w2
            pl.BlockSpec((h_pad, o), lambda i: (0, 0)),       # w3
            pl.BlockSpec((3, w_bias), lambda i: (0, 0)),      # packed biases (f32)
        ],
        out_specs=pl.BlockSpec((tile_b, o), lambda i: (i, 0)),  # direct (B, O) write
        compiler_params=pltpu.CompilerParams(
            dimension_semantics=("parallel",)),
    )(x, packed["w1"], packed["w2"], packed["w3"], packed["b"])


def reference_forward(x, p):
    h = jnp.maximum(x @ p["w1"] + p["b1"], 0.0)
    h = jnp.maximum(h @ p["w2"] + p["b2"], 0.0)
    return h @ p["w3"] + p["b3"]


if __name__ == "__main__":
    key = jax.random.PRNGKey(0)
    k_x, k_p, k_x2 = jax.random.split(key, 3)

    B, INPUT_DIM, HIDDEN_DIM, OUTPUT_DIM = 8, 32, 64, 2

    x = jax.random.normal(k_x, (B, INPUT_DIM), jnp.float32)
    params = init_params(k_p, INPUT_DIM, HIDDEN_DIM, OUTPUT_DIM)
    packed = pack_params(params)                 # one-time (model-load) packing

    out = jax.block_until_ready(sentence_to_vector_forward(x, packed))
    ref = reference_forward(x, params)
    assert out.shape == (B, OUTPUT_DIM), out.shape
    assert jnp.allclose(out, ref, atol=1e-5, rtol=1e-5), (
        f"max abs err {jnp.max(jnp.abs(out - ref))}")

    # Ragged batch: auto tile -> 2 grid steps with a masked partial last block.
    B2 = 20
    x2 = jax.random.normal(k_x2, (B2, INPUT_DIM), jnp.float32)
    out2 = jax.block_until_ready(sentence_to_vector_forward(x2, packed))
    ref2 = reference_forward(x2, params)
    assert out2.shape == (B2, OUTPUT_DIM), out2.shape
    assert jnp.allclose(out2, ref2, atol=1e-5, rtol=1e-5), (
        f"max abs err {jnp.max(jnp.abs(out2 - ref2))}")

    # bf16 inference path (halved HBM streams; f32 accumulation) — loose check.
    packed_bf16 = pack_params(params, jnp.bfloat16)
    out3 = jax.block_until_ready(
        sentence_to_vector_forward(x2.astype(jnp.bfloat16), packed_bf16))
    assert out3.shape == (B2, OUTPUT_DIM), out3.shape
    assert float(jnp.max(jnp.abs(out3 - ref2))) < 0.1, (
        f"bf16 max abs err {jnp.max(jnp.abs(out3 - ref2))}")

    print("KERNEL_OK")
</pallas_src>

<mosaic_0001>
module attributes {stable_mosaic.version = 11 : i64} {
  func.func @_mlp_kernel(%arg0: i32, %arg1: memref<8x32xf32, #tpu.memory_space<vmem>>, %arg2: memref<32x128xf32, #tpu.memory_space<vmem>>, %arg3: memref<128x128xf32, #tpu.memory_space<vmem>>, %arg4: memref<128x2xf32, #tpu.memory_space<vmem>>, %arg5: memref<3x128xf32, #tpu.memory_space<vmem>>, %arg6: memref<8x2xf32, #tpu.memory_space<vmem>>) attributes {dimension_semantics = [#tpu.dimension_semantics<parallel>], iteration_bounds = array<i64: 1>, scalar_prefetch = 0 : i64, scratch_operands = 0 : i64, tpu.core_type = #tpu.core_type<tc>, window_params = [{transform_indices = @transform_0, window_bounds = array<i64: 8, 32>}, {pipeline_mode = #tpu.pipeline_mode<synchronous>, transform_indices = @transform_1, window_bounds = array<i64: 32, 128>}, {pipeline_mode = #tpu.pipeline_mode<synchronous>, transform_indices = @transform_2, window_bounds = array<i64: 128, 128>}, {pipeline_mode = #tpu.pipeline_mode<synchronous>, transform_indices = @transform_3, window_bounds = array<i64: 128, 2>}, {pipeline_mode = #tpu.pipeline_mode<synchronous>, transform_indices = @transform_4, window_bounds = array<i64: 3, 128>}, {transform_indices = @transform_5, window_bounds = array<i64: 8, 2>}]} {
    %c0 = arith.constant 0 : index
    %c0_0 = arith.constant 0 : index
    %0 = vector.load %arg1[%c0, %c0_0] : memref<8x32xf32, #tpu.memory_space<vmem>>, vector<8x32xf32>
    %c0_1 = arith.constant 0 : index
    %c0_2 = arith.constant 0 : index
    %1 = vector.load %arg5[%c0_1, %c0_2] : memref<3x128xf32, #tpu.memory_space<vmem>>, vector<3x128xf32>
    %c0_3 = arith.constant 0 : index
    %c0_4 = arith.constant 0 : index
    %2 = vector.load %arg2[%c0_3, %c0_4] : memref<32x128xf32, #tpu.memory_space<vmem>>, vector<32x128xf32>
    %cst = arith.constant dense<0.000000e+00> : vector<8x128xf32>
    %3 = tpu.matmul %0, %2, %cst {dimension_numbers = #tpu.dot_dimension_numbers<[1], [0], [0], [1], [0, 0, 1, 1], [], []>} : vector<8x32xf32>, vector<32x128xf32>, vector<8x128xf32> -> vector<8x128xf32>
    %4 = vector.extract_strided_slice %1 {offsets = [0, 0], sizes = [1, 128], strides = [1, 1]} : vector<3x128xf32> to vector<1x128xf32>
    %5 = vector.broadcast %4 : vector<1x128xf32> to vector<8x128xf32>
    %6 = arith.addf %3, %5 : vector<8x128xf32>
    %cst_5 = arith.constant 0.000000e+00 : f32
    %7 = vector.broadcast %cst_5 : f32 to vector<8x128xf32>
    %8 = arith.maximumf %6, %7 : vector<8x128xf32>
    %c0_6 = arith.constant 0 : index
    %c0_7 = arith.constant 0 : index
    %9 = vector.load %arg3[%c0_6, %c0_7] : memref<128x128xf32, #tpu.memory_space<vmem>>, vector<128x128xf32>
    %cst_8 = arith.constant dense<0.000000e+00> : vector<8x128xf32>
    %10 = tpu.matmul %8, %9, %cst_8 {dimension_numbers = #tpu.dot_dimension_numbers<[1], [0], [0], [1], [0, 0, 1, 1], [], []>} : vector<8x128xf32>, vector<128x128xf32>, vector<8x128xf32> -> vector<8x128xf32>
    %11 = vector.extract_strided_slice %1 {offsets = [1, 0], sizes = [1, 128], strides = [1, 1]} : vector<3x128xf32> to vector<1x128xf32>
    %12 = vector.broadcast %11 : vector<1x128xf32> to vector<8x128xf32>
    %13 = arith.addf %10, %12 : vector<8x128xf32>
    %cst_9 = arith.constant 0.000000e+00 : f32
    %14 = vector.broadcast %cst_9 : f32 to vector<8x128xf32>
    %15 = arith.maximumf %13, %14 : vector<8x128xf32>
    %c0_10 = arith.constant 0 : index
    %c0_11 = arith.constant 0 : index
    %16 = vector.load %arg4[%c0_10, %c0_11] : memref<128x2xf32, #tpu.memory_space<vmem>>, vector<128x2xf32>
    %cst_12 = arith.constant dense<0.000000e+00> : vector<8x2xf32>
    %17 = tpu.matmul %15, %16, %cst_12 {dimension_numbers = #tpu.dot_dimension_numbers<[1], [0], [0], [1], [0, 0, 1, 1], [], []>} : vector<8x128xf32>, vector<128x2xf32>, vector<8x2xf32> -> vector<8x2xf32>
    %18 = vector.extract_strided_slice %1 {offsets = [2, 0], sizes = [1, 2], strides = [1, 1]} : vector<3x128xf32> to vector<1x2xf32>
    %19 = vector.broadcast %18 : vector<1x2xf32> to vector<8x2xf32>
    %20 = arith.addf %17, %19 : vector<8x2xf32>
    %c0_13 = arith.constant 0 : index
    %c0_14 = arith.constant 0 : index
    %21 = vector.load %arg6[%c0_13, %c0_14] : memref<8x2xf32, #tpu.memory_space<vmem>>, vector<8x2xf32>
    tpu.vector_store %arg6[%c0_13, %c0_14], %20 {strides = array<i32>} : memref<8x2xf32, #tpu.memory_space<vmem>>, vector<8x2xf32>,
    return
  }
  func.func @transform_0(%arg0: i32) -> (i32, i32) {
    %c0_i32 = arith.constant 0 : i32
    %c0_i32_0 = arith.constant 0 : i32
    return %arg0, %c0_i32 : i32, i32
  }
  func.func @transform_1(%arg0: i32) -> (i32, i32) {
    %c0_i32 = arith.constant 0 : i32
    %c0_i32_0 = arith.constant 0 : i32
    %c0_i32_1 = arith.constant 0 : i32
    return %c0_i32, %c0_i32_0 : i32, i32
  }
  func.func @transform_2(%arg0: i32) -> (i32, i32) {
    %c0_i32 = arith.constant 0 : i32
    %c0_i32_0 = arith.constant 0 : i32
    %c0_i32_1 = arith.constant 0 : i32
    return %c0_i32, %c0_i32_0 : i32, i32
  }
  func.func @transform_3(%arg0: i32) -> (i32, i32) {
    %c0_i32 = arith.constant 0 : i32
    %c0_i32_0 = arith.constant 0 : i32
    %c0_i32_1 = arith.constant 0 : i32
    return %c0_i32, %c0_i32_0 : i32, i32
  }
  func.func @transform_4(%arg0: i32) -> (i32, i32) {
    %c0_i32 = arith.constant 0 : i32
    %c0_i32_0 = arith.constant 0 : i32
    %c0_i32_1 = arith.constant 0 : i32
    return %c0_i32, %c0_i32_0 : i32, i32
  }
  func.func @transform_5(%arg0: i32) -> (i32, i32) {
    %c0_i32 = arith.constant 0 : i32
    %c0_i32_0 = arith.constant 0 : i32
    return %arg0, %c0_i32 : i32, i32
  }
}

</mosaic_0001>

<bundles_post_ra>
// kernel: tpu_custom_call.1
= control target key start
LH: loop header
LB: loop body
LE: loop exit
PB: predicated region body
PF: predicated region fallthrough
CT: control target
= control target key end

     0   :  { %10 = vsyncpa [#allocation3], 0  ;;  %s677_s0 = inlined_call_operand.hbm [shape: f32[8,32], index: 0, kind: input, shape index: {}]   ;;  %s678_s1 = inlined_call_operand.hbm [shape: f32[32,128], index: 1, kind: input, shape index: {}]   ;;  %s679_s2 = inlined_call_operand.vmem [shape: f32[128,128], index: 2, kind: input, shape index: {}]   ;;  %s680_s3 = inlined_call_operand.vmem [shape: f32[128,2], index: 3, kind: input, shape index: {}]   ;;  %s681_s4 = inlined_call_operand.vmem [shape: f32[3,128], index: 4, kind: input, shape index: {}]   ;;  %s682_s5 = inlined_call_operand.vmem [shape: f32[8,2], index: 5, kind: output, shape index: {}]  }
   0x1   :  { %11 = vsyncpa [#allocation5], 0  ;;  %s491_s18 = smov [#allocation2]   ;;  %s492_s20 = smov [#allocation4]  }
   0x2   :  { %s18_s19 = sshll.u32 %s491_s18, 4  ;;  %s27_s21 = sshll.u32 %s492_s20, 4  ;;  %s19_s19 = int_to_ptr.vmem [resolvable:$true] %s18_s19  ;;  %s28_s21 = int_to_ptr.vmem [resolvable:$true] %s27_s21 }
   0x3   :  { %s455_s22 = scalar_lea.vmem %s19_s19, 128  ;;  %p460_p1 = scmp.lt.s32.totalorder %s19_s19, %s19_s19 }
   0x4   :  { %p456_p0 = scmp.ne.s32.totalorder %s19_s19, %s455_s22  ;;  %p461_p2 = scmp.lt.s32.totalorder %s455_s22, %s455_s22 }
   0x6   :  { %p462_p3 = por %p461_p2, %p460_p1 }
   0x8   :  { %p463_p4 = pnand %p462_p3, %p456_p0 }
   0xa   :  { %466 = shalt.err (!%p463_p4)
}
   0xb   :  { %21 = dma.hbm_to_vmem [thread:$0]  %s677_s0, 128, %s19_s19, [#allocation3]  }
   0xc   :  { %s475_s25 = scalar_lea.vmem %s28_s21, 512  ;;  %p480_p6 = scmp.lt.s32.totalorder %s28_s21, %s28_s21 }
   0xd   :  { %p476_p5 = scmp.ne.s32.totalorder %s28_s21, %s475_s25  ;;  %p481_p7 = scmp.lt.s32.totalorder %s475_s25, %s475_s25 }
   0xf   :  { %p482_p8 = por %p481_p7, %p480_p6 }
  0x11   :  { %p483_p9 = pnand %p482_p8, %p476_p5 }
  0x13   :  { %486 = shalt.err (!%p483_p9)
}
  0x14   :  { %s493_s26 = smov 128   ;;  %s494_s27 = smov 8  }
  0x15   :  { %33 = dma.hbm_to_vmem [thread:$0]  %s678_s1, 512, %s28_s21, [#allocation5], %s493_s26, %s493_s26, %s494_s27  }
  0x16   :  { %487 = dma.done.wait [#allocation3], 128  }
  0x17   :  { %488 = vsyncadd [#allocation3], 4294967168 }
  0x18   :  { %489 = dma.done.wait [#allocation5], 512  }
  0x19   :  { %490 = vsyncadd [#allocation5], 4294966784  ;;  %v495_v0 = vmov 0.0   ;;  %vm496_vm0 = vmmov 0   ;;  %v51_v1 = vld [vmem:[#allocation4 + $0x18] sm:$0xff]  ;;  %v50_v2 = vld [vmem:[#allocation4 + $0x10] sm:$0xff]  ;;  %v52_v35 = vlaneseq }
  0x1a   :  { %360 = vmatprep.subr.mxu0 %v495_v0  ;;  %368 = vmatprep.mubr.msk.f32.mxu0 %vm496_vm0, %v495_v0  ;;  %v146_v3 = vld [vmem:[%s679_s2 + $0x78] sm:$0xff]  ;;  %v49_v4 = vld [vmem:[#allocation4 + $0x8] sm:$0xff]  ;;  %v144_v6 = vld [vmem:[%s679_s2 + $0x68] sm:$0xff]  ;;  %vm56_vm1 = vcmask 261120   ;;  %vm312_vm2 = vcmask 15360  }
  0x1b   :  { %371 = vmatprep.subr.mxu1 %v495_v0  ;;  %403 = vmatprep.mubr.msk.f32.mxu1 %vm496_vm0, %v495_v0  ;;  %v145_v5 = vld [vmem:[%s679_s2 + $0x70] sm:$0xff]  ;;  %v48_v7 = vld [vmem:[#allocation4] sm:$0xff]  ;;  %v46_v8 = vld [vmem:[#allocation2] sm:$0xff]  ;;  %v53_v36 = vshrl.u32 %v52_v35, 7 }
  0x1c   :  { %361 = vmatpush3.msra.mxu0 %v51_v1  ;;  %372 = vmatpush3.msra.mxu1 %v146_v3  ;;  %v143_v9 = vld [vmem:[%s679_s2 + $0x60] sm:$0xff]  ;;  %v142_v10 = vld [vmem:[%s679_s2 + $0x58] sm:$0xff]  ;;  %v141_v11 = vld [vmem:[%s679_s2 + $0x50] sm:$0xff] }
  0x1d   :  { %362 = vmatprep.subr.mxu0 %v495_v0  ;;  %373 = vmatprep.subr.mxu1 %v495_v0  ;;  %v140_v12 = vld [vmem:[%s679_s2 + $0x48] sm:$0xff]  ;;  %v139_v13 = vld [vmem:[%s679_s2 + $0x40] sm:$0xff]  ;;  %v138_v14 = vld [vmem:[%s679_s2 + $0x38] sm:$0xff]  ;;  %v54_v37 = vsub.s32 0, %v53_v36  ;;  %v149_v47 = vsub.s32 1, %v53_v36  ;;  %v240_v53 = vsub.s32 2, %v53_v36 }
  0x1e   :  { %363 = vmatpush3.msra.mxu0 %v50_v2  ;;  %374 = vmatpush3.msra.mxu1 %v145_v5  ;;  %v137_v15 = vld [vmem:[%s679_s2 + $0x30] sm:$0xff]  ;;  %v136_v16 = vld [vmem:[%s679_s2 + $0x28] sm:$0xff]  ;;  %v135_v17 = vld [vmem:[%s679_s2 + $0x20] sm:$0xff] }
  0x1f   :  { %364 = vmatprep.subr.mxu0 %v495_v0  ;;  %375 = vmatprep.subr.mxu1 %v495_v0  ;;  %v134_v18 = vld [vmem:[%s679_s2 + $0x18] sm:$0xff]  ;;  %v133_v19 = vld [vmem:[%s679_s2 + $0x10] sm:$0xff]  ;;  %v132_v20 = vld [vmem:[%s679_s2 + $0x8] sm:$0xff] }
  0x20   :  { %365 = vmatpush3.msra.mxu0 %v49_v4  ;;  %376 = vmatpush3.msra.mxu1 %v144_v6  ;;  %v131_v21 = vld [vmem:[%s679_s2] sm:$0xff]  ;;  %v237_v22 = vld [vmem:[%s680_s3 + $0x78] sm:$0xff]  ;;  %v236_v23 = vld [vmem:[%s680_s3 + $0x70] sm:$0xff] }
  0x21   :  { %366 = vmatprep.subr.mxu0 %v495_v0  ;;  %377 = vmatprep.subr.mxu1 %v495_v0  ;;  %v235_v24 = vld [vmem:[%s680_s3 + $0x68] sm:$0xff]  ;;  %v234_v25 = vld [vmem:[%s680_s3 + $0x60] sm:$0xff]  ;;  %v233_v26 = vld [vmem:[%s680_s3 + $0x58] sm:$0xff] }
  0x22   :  { %367 = vmatpush3.msra.mxu0 %v48_v7  ;;  %378 = vmatpush3.msra.mxu1 %v143_v9  ;;  %v232_v27 = vld [vmem:[%s680_s3 + $0x50] sm:$0xff]  ;;  %v231_v28 = vld [vmem:[%s680_s3 + $0x48] sm:$0xff]  ;;  %v230_v29 = vld [vmem:[%s680_s3 + $0x40] sm:$0xff] }
  0x23   :  { %369 = vmatmul.mubr.msk.f32.vlgmr.msra.gmra.mxu0 %vm56_vm1, %v46_v8  ;;  %379 = vmatprep.subr.mxu1 %v495_v0  ;;  %v229_v30 = vld [vmem:[%s680_s3 + $0x38] sm:$0xff]  ;;  %v228_v31 = vld [vmem:[%s680_s3 + $0x30] sm:$0xff]  ;;  %v227_v32 = vld [vmem:[%s680_s3 + $0x28] sm:$0xff] }
  0x24   :  { %406 = vmatprep.subr.mxu0 %v495_v0  ;;  %380 = vmatpush3.msra.mxu1 %v142_v10  ;;  %v226_v33 = vld [vmem:[%s680_s3 + $0x20] sm:$0xff]  ;;  %v225_v34 = vld [vmem:[%s680_s3 + $0x18] sm:$0xff]  ;;  %v224_v44 = vld [vmem:[%s680_s3 + $0x10] sm:$0xff] }
  0x25   :  { %438 = vmatprep.mubr.msk.f32.mxu0 %vm496_vm0, %v495_v0  ;;  %381 = vmatprep.subr.mxu1 %v495_v0  ;;  %v47_v38 = vld [vmem:[%s681_s4] sm:$0x7]  ;;  %v223_v45 = vld [vmem:[%s680_s3 + $0x8] sm:$0xff] }
  0x26   :  { %382 = vmatpush3.msra.mxu1 %v141_v11  ;;  %407 = vmatpush3.msra.mxu0 %v237_v22  ;;  %v55_v39 = vrot.slane %v47_v38, %v54_v37  ;;  %v222_v46 = vld [vmem:[%s680_s3] sm:$0xff]  ;;  %v150_v48 = vrot.slane %v47_v38, %v149_v47  ;;  %v241_v54 = vrot.slane %v47_v38, %v240_v53 }
  0x27   :  { %383 = vmatprep.subr.mxu1 %v495_v0  ;;  %408 = vmatprep.subr.mxu0 %v495_v0 }
  0x28   :  { %384 = vmatpush3.msra.mxu1 %v140_v12  ;;  %409 = vmatpush3.msra.mxu0 %v236_v23 }
  0x29   :  { %385 = vmatprep.subr.mxu1 %v495_v0  ;;  %410 = vmatprep.subr.mxu0 %v495_v0 }
  0x2a   :  { %386 = vmatpush3.msra.mxu1 %v139_v13  ;;  %411 = vmatpush3.msra.mxu0 %v235_v24 }
  0x2b   :  { %387 = vmatprep.subr.mxu1 %v495_v0  ;;  %412 = vmatprep.subr.mxu0 %v495_v0 }
  0x2c   :  { %388 = vmatpush3.msra.mxu1 %v138_v14  ;;  %413 = vmatpush3.msra.mxu0 %v234_v25 }
  0x2d   :  { %389 = vmatprep.subr.mxu1 %v495_v0  ;;  %414 = vmatprep.subr.mxu0 %v495_v0 }
  0x2e   :  { %390 = vmatpush3.msra.mxu1 %v137_v15  ;;  %415 = vmatpush3.msra.mxu0 %v233_v26 }
  0x2f   :  { %391 = vmatprep.subr.mxu1 %v495_v0  ;;  %416 = vmatprep.subr.mxu0 %v495_v0 }
  0x30   :  { %392 = vmatpush3.msra.mxu1 %v136_v16  ;;  %417 = vmatpush3.msra.mxu0 %v232_v27 }
  0x31   :  { %393 = vmatprep.subr.mxu1 %v495_v0  ;;  %418 = vmatprep.subr.mxu0 %v495_v0 }
  0x32   :  { %394 = vmatpush3.msra.mxu1 %v135_v17  ;;  %419 = vmatpush3.msra.mxu0 %v231_v28 }
  0x33   :  { %395 = vmatprep.subr.mxu1 %v495_v0  ;;  %420 = vmatprep.subr.mxu0 %v495_v0 }
  0x34   :  { %396 = vmatpush3.msra.mxu1 %v134_v18  ;;  %421 = vmatpush3.msra.mxu0 %v230_v29 }
  0x35   :  { %397 = vmatprep.subr.mxu1 %v495_v0  ;;  %422 = vmatprep.subr.mxu0 %v495_v0 }
  0x36   :  { %398 = vmatpush3.msra.mxu1 %v133_v19  ;;  %423 = vmatpush3.msra.mxu0 %v229_v30 }
  0x37   :  { %399 = vmatprep.subr.mxu1 %v495_v0  ;;  %424 = vmatprep.subr.mxu0 %v495_v0 }
  0x38   :  { %400 = vmatpush3.msra.mxu1 %v132_v20  ;;  %425 = vmatpush3.msra.mxu0 %v228_v31 }
  0x39   :  { %401 = vmatprep.subr.mxu1 %v495_v0  ;;  %426 = vmatprep.subr.mxu0 %v495_v0 }
  0x3a   :  { %402 = vmatpush3.msra.mxu1 %v131_v21  ;;  %427 = vmatpush3.msra.mxu0 %v227_v32 }
  0x3b   :  { %428 = vmatprep.subr.mxu0 %v495_v0 }
  0x3c   :  { %429 = vmatpush3.msra.mxu0 %v226_v33 }
  0x3d   :  { %430 = vmatprep.subr.mxu0 %v495_v0 }
  0x3e   :  { %431 = vmatpush3.msra.mxu0 %v225_v34 }
  0x3f   :  { %432 = vmatprep.subr.mxu0 %v495_v0 }
  0x40   :  { %433 = vmatpush3.msra.mxu0 %v224_v44 }
  0x41   :  { %434 = vmatprep.subr.mxu0 %v495_v0 }
  0x42   :  { %435 = vmatpush3.msra.mxu0 %v223_v45 }
  0x43   :  { %436 = vmatprep.subr.mxu0 %v495_v0 }
  0x44   :  { %437 = vmatpush3.msra.mxu0 %v222_v46 }
  0xe3   :  { %v126_v40 = vpop.f32.mrf.mxu0 }
  0xe4   :  { %v127_v41 = vadd.f32 %v126_v40, %v55_v39 }
  0xe5   :  { %v370_v42 = vpop.f32.mrf.mxu0 }
  0xe6   :  { %v130_v43 = vmax.f32 %v127_v41, 0.0 }
  0xe8   :  { %404 = vmatmul.mubr.f32.vlgmr.msra.gmra.mxu1 %v130_v43 }
 0x1a8   :  { %v217_v49 = vpop.f32.mrf.mxu1 }
 0x1a9   :  { %v218_v50 = vadd.f32 %v217_v49, %v150_v48 }
 0x1aa   :  { %v405_v51 = vpop.f32.mrf.mxu1 }
 0x1ab   :  { %v221_v52 = vmax.f32 %v218_v50, 0.0 }
 0x1ad   :  { %439 = vmatmul.mubr.f32.vlgmr.msra.gmra.mxu0 %v221_v52 }
 0x26d   :  { %v308_v55 = vpop.f32.mrf.mxu0 }
 0x26e   :  { %v309_v56 = vadd.f32 %v308_v55, %v241_v54 }
 0x26f   :  { %v440_v57 = vpop.f32.mrf.mxu0 }
 0x270   :  { %313 = vst.msk [vmem:[%s682_s5] sm:$0xff] %vm312_vm2, %v309_v56 }
 0x271   :  { %318 = vsyncpa [#allocation3], 1 }
 0x272   :  { %319 = vsyncpa [#allocation5], 1 }

</bundles_post_ra>
